<compile_context>
chip_gen: v7x
topology: tpu7x:2x2x1
jax: 0.10.0
libtpu: 0.0.40
codegen_flags: <defaults>
</compile_context>

<pallas_src>
import functools
import math

import jax
import jax.numpy as jnp
from jax.experimental import pallas as pl
from jax.experimental.pallas import tpu as pltpu

_EPS = 1e-8
_LANE = 128


# ---------------------------------------------------------------------------
# Helpers
# ---------------------------------------------------------------------------
def _round_up(n, m):
    return ((n + m - 1) // m) * m


def _sublane_multiple(dtype):
    # fp32 -> 8, bf16 -> 16, int8/fp8 -> 32 (sub-32-bit dtypes pack along sublanes).
    return max(8, 32 // dtype.itemsize)


def _vmem_limit_bytes():
    """Generation-aware VMEM limit for the pallas_call."""
    cap = None
    try:
        info = pltpu.get_tpu_info()
        cap = getattr(info, "vmem_capacity_bytes", None)
    except Exception:
        cap = None
    if not cap:
        cap = 64 * 1024 * 1024          # unknown -> assume the smallest per-core VMEM (v7x)
    if cap <= 64 * 1024 * 1024:
        return 40 * 1024 * 1024         # v7x-class: leave headroom for compiler scratch
    return 64 * 1024 * 1024             # v5e / v6e (128 MiB physical): bigger blocks


def _pick_row_tile(M, Hp, isx, isy, iso, sub, vmem_limit):
    """Rows per grid step for the elementwise row kernel (budget-driven, no step floor).

    Per-row VMEM cost of one grid step:
      - double-buffered input blocks : 2 * Hp * (isx + isy)
      - double-buffered (tm,1) output: 2 * 128 * iso     (lane-padded column)
      - in-kernel f32 temporaries    : ~3 * Hp * 4       (x/y upcasts + one product live)
    """
    per_row = 2 * Hp * (isx + isy) + 2 * _LANE * iso + 3 * Hp * 4
    budget = (7 * vmem_limit) // 10     # keep ~30% slack for compiler scratch
    tm = max(sub, (budget // per_row) // sub * sub)
    if tm >= M:
        return M                        # single full block (always a legal block shape)
    return tm


def _pick_pairwise_tiles(A, B, Hp, isx, isy, iso, vmem_limit):
    """Row tiles (tb over x-rows, tn over y-rows) for the pairwise MXU kernel."""
    budget = (7 * vmem_limit) // 10

    def fits(tb, tn):
        tnp = _round_up(tn, _LANE)
        blocks = 2 * (tb * Hp * isx + tn * Hp * isy       # x / y tiles (double-buffered)
                      + tb * tnp * iso                    # output tile
                      + tb * _LANE * 4 + 8 * tnp * 4)     # ||x||^2 / ||y||^2 tiles
        temps = 4 * tb * tnp * 4                          # f32 dot result + elementwise temps
        return blocks + temps <= budget

    for t in (512, 256, 128):
        tb = A if A <= t else t         # "== full dim" or a multiple of 8
        tn = B if B <= t else t         # "== full dim" or a multiple of 128
        if fits(tb, tn):
            return tb, tn
    return (A if A <= 128 else 128), (B if B <= 128 else 128)


def _outer_broadcast_split(x_lead, y_lead):
    """Detect pure outer-product leading-dim broadcasts (e.g. [B,1,H] x [1,N,H]).

    Returns ("xy"|"yx", rows_of_x, rows_of_y) or None.  "xy" means the flattened output
    index is (x rows, y rows); "yx" means (y rows, x rows).
    """
    n = max(len(x_lead), len(y_lead))
    xs = (1,) * (n - len(x_lead)) + tuple(x_lead)
    ys = (1,) * (n - len(y_lead)) + tuple(y_lead)
    x_axes = [d for d in range(n) if xs[d] != 1]
    y_axes = [d for d in range(n) if ys[d] != 1]
    if set(x_axes) & set(y_axes):
        return None                     # a leading axis is shared -> not an outer product
    A = math.prod(x_lead)
    B = math.prod(y_lead)
    if not x_axes or not y_axes or max(x_axes) < min(y_axes):
        return ("xy", A, B)
    if max(y_axes) < min(x_axes):
        return ("yx", A, B)
    return None                         # interleaved varying axes -> fall back


# ---------------------------------------------------------------------------
# Kernels
# ---------------------------------------------------------------------------
def _row_cosine_kernel(x_ref, y_ref, o_ref, *, inv_temp):
    # x_ref, y_ref: (TM, H) tiles in VMEM; o_ref: (TM, 1).  Exact f32 VPU/XLU reductions.
    x = x_ref[...].astype(jnp.float32)
    y = y_ref[...].astype(jnp.float32)
    dot = jnp.sum(x * y, axis=-1, keepdims=True)
    nx2 = jnp.sum(x * x, axis=-1, keepdims=True)
    ny2 = jnp.sum(y * y, axis=-1, keepdims=True)
    denom2 = jnp.maximum(nx2 * ny2, _EPS * _EPS)
    o_ref[...] = (dot * jax.lax.rsqrt(denom2) * inv_temp).astype(o_ref.dtype)


def _pairwise_cosine_kernel(x_ref, y_ref, nx_ref, ny_ref, o_ref, *, inv_temp):
    # x_ref: (TB, H) rows of x, y_ref: (TN, H) rows of y,
    # nx_ref: (TB, 1) ||x||^2, ny_ref: (1, TN) ||y||^2, o_ref: (TB, TN).
    # The dot runs on the MXU; contraction of the last dims of both operands (q@k^T pattern).
    # TODO(synk): pass precision=jax.lax.Precision.HIGHEST if exact f32 parity with torch is
    #             required (the default TPU f32 matmul path may use bf16 passes).
    dot = jax.lax.dot_general(
        x_ref[...], y_ref[...],
        dimension_numbers=(((1,), (1,)), ((), ())),
        preferred_element_type=jnp.float32,
    )
    denom2 = jnp.maximum(nx_ref[...] * ny_ref[...], _EPS * _EPS)   # (TB,1)*(1,TN) -> (TB,TN)
    o_ref[...] = (dot * jax.lax.rsqrt(denom2) * inv_temp).astype(o_ref.dtype)


# ---------------------------------------------------------------------------
# Wrappers
# ---------------------------------------------------------------------------
def _row_cosine(xr, yr, inv_temp, out_dtype, vmem_limit):
    M, H = xr.shape
    Hp = _round_up(H, _LANE)
    isx = xr.dtype.itemsize
    isy = yr.dtype.itemsize
    iso = jnp.dtype(out_dtype).itemsize if hasattr(jnp, "dtype") else out_dtype.itemsize
    sub = max(_sublane_multiple(xr.dtype), _sublane_multiple(yr.dtype))
    tm = _pick_row_tile(M, Hp, isx, isy, iso, sub, vmem_limit)
    grid = (pl.cdiv(M, tm),)   # ragged final block handled by Pallas masking (no jnp.pad)

    kernel = functools.partial(_row_cosine_kernel, inv_temp=inv_temp)
    cost = pl.CostEstimate(
        flops=int(6 * M * H),
        transcendentals=int(M),
        bytes_accessed=int(M * H * (isx + isy) + M * iso),
    )
    return pl.pallas_call(
        kernel,
        out_shape=jax.ShapeDtypeStruct((M, 1), out_dtype),
        grid_spec=pltpu.PrefetchScalarGridSpec(
            num_scalar_prefetch=0,
            grid=grid,
            in_specs=[
                pl.BlockSpec((tm, H), lambda i: (i, 0)),
                pl.BlockSpec((tm, H), lambda i: (i, 0)),
            ],
            out_specs=pl.BlockSpec((tm, 1), lambda i: (i, 0)),
        ),
        compiler_params=pltpu.CompilerParams(
            dimension_semantics=("parallel",),
            vmem_limit_bytes=vmem_limit,
        ),
        cost_estimate=cost,
    )(xr, yr)


def _pairwise_cosine(xr, yr, inv_temp, out_dtype, vmem_limit):
    """cos(x_i, y_j) / temp for all row pairs, without materializing the broadcast."""
    A, H = xr.shape
    B = yr.shape[0]
    Hp = _round_up(H, _LANE)
    isx = xr.dtype.itemsize
    isy = yr.dtype.itemsize
    iso = jnp.dtype(out_dtype).itemsize if hasattr(jnp, "dtype") else out_dtype.itemsize
    tb, tn = _pick_pairwise_tiles(A, B, Hp, isx, isy, iso, vmem_limit)

    # Exact f32 squared norms, computed once in the wrapper (fused reductions in XLA) and
    # streamed as tiny sublane-oriented (A,1) / lane-oriented (1,B) inputs -> no in-kernel
    # relayout is needed and the clamp-on-the-product semantics are preserved exactly.
    xf = xr.astype(jnp.float32)
    yf = yr.astype(jnp.float32)
    nx = jnp.sum(xf * xf, axis=-1, keepdims=True)            # (A, 1)
    ny = jnp.sum(yf * yf, axis=-1, keepdims=True).T          # (1, B)

    kernel = functools.partial(_pairwise_cosine_kernel, inv_temp=inv_temp)
    cost = pl.CostEstimate(
        flops=int(2 * A * B * H + 4 * A * B),
        transcendentals=int(A * B),
        bytes_accessed=int(A * H * isx + B * H * isy + A * B * iso + 4 * (A + B)),
    )
    grid = (pl.cdiv(A, tb), pl.cdiv(B, tn))
    return pl.pallas_call(
        kernel,
        out_shape=jax.ShapeDtypeStruct((A, B), out_dtype),
        grid_spec=pltpu.PrefetchScalarGridSpec(
            num_scalar_prefetch=0,
            grid=grid,
            in_specs=[
                pl.BlockSpec((tb, H), lambda i, j: (i, 0)),   # x rows: reused across inner j
                pl.BlockSpec((tn, H), lambda i, j: (j, 0)),   # y rows: streamed
                pl.BlockSpec((tb, 1), lambda i, j: (i, 0)),   # ||x||^2 (sublane-oriented)
                pl.BlockSpec((1, tn), lambda i, j: (0, j)),   # ||y||^2 (lane-oriented)
            ],
            out_specs=pl.BlockSpec((tb, tn), lambda i, j: (i, j)),
        ),
        compiler_params=pltpu.CompilerParams(
            dimension_semantics=("parallel", "parallel"),
            vmem_limit_bytes=vmem_limit,
        ),
        cost_estimate=cost,
    )(xr, yr, nx, ny)


def similarity(x, y, temp=None):
    """Cosine similarity along dim=-1, divided by temp (default 1.0)."""
    if temp is None:
        temp = 1.0
    inv_temp = 1.0 / float(temp)

    x = jnp.asarray(x)
    y = jnp.asarray(y)
    cdt = jnp.promote_types(x.dtype, y.dtype)
    if not jnp.issubdtype(cdt, jnp.floating):
        cdt = jnp.float32
    if x.dtype != cdt:
        x = x.astype(cdt)
    if y.dtype != cdt:
        y = y.astype(cdt)

    bshape = jnp.broadcast_shapes(x.shape, y.shape)
    H = bshape[-1]
    lead = bshape[:-1]
    out_dtype = cdt
    vmem_limit = _vmem_limit_bytes()

    # Outer-product leading-dim broadcast (e.g. SimCSE [B,1,H] x [1,N,H]): express the
    # broadcast through the 2-D grid index_maps instead of materializing it in HBM.
    split = None
    if x.shape[-1] == y.shape[-1] and x.shape[:-1] != y.shape[:-1]:
        split = _outer_broadcast_split(x.shape[:-1], y.shape[:-1])
    if split is not None:
        order, A, B = split
        x2 = x.reshape(A, H)
        y2 = y.reshape(B, H)
        if order == "xy":
            p = _pairwise_cosine(x2, y2, inv_temp, out_dtype, vmem_limit)   # (A, B)
        else:
            # cosine similarity is symmetric, so swapping the operands gives the layout
            # whose flattened index matches the broadcast output directly.
            p = _pairwise_cosine(y2, x2, inv_temp, out_dtype, vmem_limit)   # (B, A)
        return p.reshape(lead)

    # Elementwise row path.
    # TODO(synk): mixed broadcasts (shared + outer leading axes) still materialize the
    # expanded operand; they could be expressed with per-axis index_maps for full generality.
    if x.shape != bshape:
        x = jnp.broadcast_to(x, bshape)
    if y.shape != bshape:
        y = jnp.broadcast_to(y, bshape)
    M = math.prod(lead)
    out = _row_cosine(x.reshape(M, H), y.reshape(M, H), inv_temp, out_dtype, vmem_limit)
    return out.reshape(lead)


# ---------------------------------------------------------------------------
# Reference + self-test
# ---------------------------------------------------------------------------
def _reference(x, y, temp=1.0):
    xb, yb = jnp.broadcast_arrays(x, y)
    xb = xb.astype(jnp.float32)
    yb = yb.astype(jnp.float32)
    w12 = jnp.sum(xb * yb, axis=-1)
    w1 = jnp.sum(xb * xb, axis=-1)
    w2 = jnp.sum(yb * yb, axis=-1)
    return (w12 / jnp.sqrt(jnp.maximum(w1 * w2, _EPS * _EPS))) / temp


if __name__ == "__main__":
    key = jax.random.PRNGKey(0)
    kx, ky, ka, kb, kc = jax.random.split(key, 5)
    temp = 0.05  # typical SimCSE-style temperature

    # Case 1: matching shapes (batch=2, seq=8, hidden=32) -> elementwise row kernel.
    x = jax.random.normal(kx, (2, 8, 32), dtype=jnp.float32)
    y = jax.random.normal(ky, (2, 8, 32), dtype=jnp.float32)
    out = jax.block_until_ready(similarity(x, y, temp=temp))
    ref = _reference(x, y, temp=temp)
    assert out.shape == (2, 8), out.shape
    assert jnp.allclose(out, ref, atol=1e-5, rtol=1e-5), float(jnp.max(jnp.abs(out - ref)))

    # Case 2: SimCSE-style broadcast [B,1,H] x [1,B,H] -> pairwise MXU kernel (no broadcast_to).
    a = jax.random.normal(ka, (8, 1, 32), dtype=jnp.float32)
    b = jax.random.normal(kb, (1, 8, 32), dtype=jnp.float32)
    out2 = jax.block_until_ready(similarity(a, b, temp=temp))
    ref2 = _reference(a, b, temp=temp)
    assert out2.shape == (8, 8), out2.shape
    # Looser tolerance: the pairwise dot runs on the MXU, whose default f32 path may use
    # bf16 passes (see the precision TODO in the kernel).
    assert jnp.allclose(out2, ref2, atol=1e-1, rtol=1e-2), float(jnp.max(jnp.abs(out2 - ref2)))

    # Case 3: leading-dim broadcast that is NOT a pure outer product -> broadcast fallback.
    c = jax.random.normal(kc, (1, 8, 32), dtype=jnp.float32)
    out3 = jax.block_until_ready(similarity(x, c, temp=temp))
    ref3 = _reference(x, c, temp=temp)
    assert out3.shape == (2, 8), out3.shape
    assert jnp.allclose(out3, ref3, atol=1e-5, rtol=1e-5), float(jnp.max(jnp.abs(out3 - ref3)))

    print("KERNEL_OK")
</pallas_src>

<mosaic_0001>
module attributes {stable_mosaic.version = 11 : i64} {
  func.func @_row_cosine_kernel(%arg0: i32, %arg1: memref<16x32xf32, #tpu.memory_space<vmem>>, %arg2: memref<16x32xf32, #tpu.memory_space<vmem>>, %arg3: memref<16x1xf32, #tpu.memory_space<vmem>>) attributes {dimension_semantics = [#tpu.dimension_semantics<parallel>], iteration_bounds = array<i64: 1>, scalar_prefetch = 0 : i64, scratch_operands = 0 : i64, tpu.core_type = #tpu.core_type<tc>, window_params = [{transform_indices = @transform_0, window_bounds = array<i64: 16, 32>}, {transform_indices = @transform_1, window_bounds = array<i64: 16, 32>}, {transform_indices = @transform_2, window_bounds = array<i64: 16, 1>}]} {
    %c0 = arith.constant 0 : index
    %c0_0 = arith.constant 0 : index
    %0 = vector.load %arg1[%c0, %c0_0] : memref<16x32xf32, #tpu.memory_space<vmem>>, vector<16x32xf32>
    %c0_1 = arith.constant 0 : index
    %c0_2 = arith.constant 0 : index
    %1 = vector.load %arg2[%c0_1, %c0_2] : memref<16x32xf32, #tpu.memory_space<vmem>>, vector<16x32xf32>
    %2 = arith.mulf %0, %1 : vector<16x32xf32>
    %cst = arith.constant dense<0.000000e+00> : vector<16xf32>
    %3 = vector.multi_reduction <add>, %2, %cst [1] : vector<16x32xf32> to vector<16xf32>
    %4 = vector.shape_cast %3 : vector<16xf32> to vector<16x1xf32>
    %5 = arith.mulf %0, %0 : vector<16x32xf32>
    %cst_3 = arith.constant dense<0.000000e+00> : vector<16xf32>
    %6 = vector.multi_reduction <add>, %5, %cst_3 [1] : vector<16x32xf32> to vector<16xf32>
    %7 = vector.shape_cast %6 : vector<16xf32> to vector<16x1xf32>
    %8 = arith.mulf %1, %1 : vector<16x32xf32>
    %cst_4 = arith.constant dense<0.000000e+00> : vector<16xf32>
    %9 = vector.multi_reduction <add>, %8, %cst_4 [1] : vector<16x32xf32> to vector<16xf32>
    %10 = vector.shape_cast %9 : vector<16xf32> to vector<16x1xf32>
    %11 = arith.mulf %7, %10 : vector<16x1xf32>
    %cst_5 = arith.constant 1.000000e-16 : f32
    %12 = vector.broadcast %cst_5 : f32 to vector<16x1xf32>
    %13 = arith.maximumf %11, %12 : vector<16x1xf32>
    %14 = math.rsqrt %13 : vector<16x1xf32>
    %15 = arith.mulf %4, %14 : vector<16x1xf32>
    %cst_6 = arith.constant 2.000000e+01 : f32
    %16 = vector.broadcast %cst_6 : f32 to vector<16x1xf32>
    %17 = arith.mulf %15, %16 : vector<16x1xf32>
    %c0_7 = arith.constant 0 : index
    %c0_8 = arith.constant 0 : index
    %18 = vector.load %arg3[%c0_7, %c0_8] : memref<16x1xf32, #tpu.memory_space<vmem>>, vector<16x1xf32>
    tpu.vector_store %arg3[%c0_7, %c0_8], %17 {strides = array<i32>} : memref<16x1xf32, #tpu.memory_space<vmem>>, vector<16x1xf32>,
    return
  }
  func.func @transform_0(%arg0: i32) -> (i32, i32) {
    %c0_i32 = arith.constant 0 : i32
    %c0_i32_0 = arith.constant 0 : i32
    return %arg0, %c0_i32 : i32, i32
  }
  func.func @transform_1(%arg0: i32) -> (i32, i32) {
    %c0_i32 = arith.constant 0 : i32
    %c0_i32_0 = arith.constant 0 : i32
    return %arg0, %c0_i32 : i32, i32
  }
  func.func @transform_2(%arg0: i32) -> (i32, i32) {
    %c0_i32 = arith.constant 0 : i32
    %c0_i32_0 = arith.constant 0 : i32
    return %arg0, %c0_i32 : i32, i32
  }
}

</mosaic_0001>

<bundles_post_ra>
// kernel: tpu_custom_call.1
= control target key start
LH: loop header
LB: loop body
LE: loop exit
PB: predicated region body
PF: predicated region fallthrough
CT: control target
= control target key end

     0   :  { %7 = vsyncpa [#allocation3], 0  ;;  %s198_s0 = inlined_call_operand.hbm [shape: f32[16,32], index: 0, kind: input, shape index: {}]   ;;  %s199_s1 = inlined_call_operand.hbm [shape: f32[16,32], index: 1, kind: input, shape index: {}]   ;;  %s200_s2 = inlined_call_operand.vmem [shape: f32[16,1], index: 2, kind: output, shape index: {}]  }
   0x1   :  { %8 = vsyncpa [#allocation5], 0  ;;  %s143_s9 = smov [#allocation2]   ;;  %s95_s13 = scalar_lea.hbm %s198_s0, 256 }
   0x2   :  { %s14_s10 = sshll.u32 %s143_s9, 4  ;;  %p96_p0 = scmp.ne.s32.totalorder %s198_s0, %s95_s13  ;;  %s15_s10 = int_to_ptr.vmem [resolvable:$true] %s14_s10 }
   0x3   :  { %p99_p1 = scmp.lt.u32.totalorder %s95_s13, %s198_s0 }
   0x5   :  { %p101_p2 = pnand %p99_p1, %p96_p0 }
   0x7   :  { %104 = shalt.err (!%p101_p2)
}
   0x8   :  { %s105_s18 = scalar_lea.vmem %s15_s10, 256  ;;  %p110_p4 = scmp.lt.s32.totalorder %s15_s10, %s15_s10 }
   0x9   :  { %p106_p3 = scmp.ne.s32.totalorder %s15_s10, %s105_s18  ;;  %p111_p5 = scmp.lt.s32.totalorder %s105_s18, %s105_s18 }
   0xb   :  { %p112_p6 = por %p111_p5, %p110_p4 }
   0xd   :  { %p113_p7 = pnand %p112_p6, %p106_p3 }
   0xf   :  { %116 = shalt.err (!%p113_p7)
}
  0x10   :  { %s144_s19 = smov 128   ;;  %s145_s20 = smov 8  }
  0x11   :  { %20 = dma.hbm_to_vmem [thread:$0]  %s198_s0, 256, %s15_s10, [#allocation3], %s144_s19, %s144_s19, %s145_s20  }
  0x12   :  { %s146_s23 = smov [#allocation4]   ;;  %s117_s27 = scalar_lea.hbm %s199_s1, 256 }
  0x13   :  { %s26_s24 = sshll.u32 %s146_s23, 4  ;;  %p118_p8 = scmp.ne.s32.totalorder %s199_s1, %s117_s27  ;;  %s27_s24 = int_to_ptr.vmem [resolvable:$true] %s26_s24 }
  0x14   :  { %p121_p9 = scmp.lt.u32.totalorder %s117_s27, %s199_s1 }
  0x16   :  { %p123_p10 = pnand %p121_p9, %p118_p8 }
  0x18   :  { %126 = shalt.err (!%p123_p10)
}
  0x19   :  { %s127_s4 = scalar_lea.vmem %s27_s24, 256  ;;  %p132_p12 = scmp.lt.s32.totalorder %s27_s24, %s27_s24 }
  0x1a   :  { %p128_p11 = scmp.ne.s32.totalorder %s27_s24, %s127_s4  ;;  %p133_p13 = scmp.lt.s32.totalorder %s127_s4, %s127_s4 }
  0x1c   :  { %p134_p0 = por %p133_p13, %p132_p12 }
  0x1e   :  { %p135_p1 = pnand %p134_p0, %p128_p11 }
  0x20   :  { %138 = shalt.err (!%p135_p1)
}
  0x21   :  { %32 = dma.hbm_to_vmem [thread:$0]  %s199_s1, 256, %s27_s24, [#allocation5], %s144_s19, %s144_s19, %s145_s20  }
  0x22   :  { %139 = dma.done.wait [#allocation3], 256  }
  0x23   :  { %140 = vsyncadd [#allocation3], 4294967040 }
  0x24   :  { %141 = dma.done.wait [#allocation5], 256  }
  0x25   :  { %142 = vsyncadd [#allocation5], 4294967040  ;;  %v41_v0 = vld [vmem:[#allocation4] sm:$0xff]  ;;  %vm45_vm0 = vcmask 261120   ;;  %v39_v1 = vld [vmem:[#allocation2] sm:$0xff]  ;;  %vm78_vm1 = vcmask 7168  }
  0x26   :  { %v42_v2 = vld [vmem:[#allocation4 + $0x8] sm:$0xff]  ;;  %v60_v3 = vmul.f32 %v41_v0, %v41_v0  ;;  %v52_v4 = vmul.f32 %v39_v1, %v39_v1  ;;  %v40_v6 = vld [vmem:[#allocation2 + $0x8] sm:$0xff]  ;;  %v43_v12 = vmul.f32 %v41_v0, %v39_v1 }
  0x27   :  { %v61_v5 = vmul.f32 %v42_v2, %v42_v2  ;;  %v53_v7 = vmul.f32 %v40_v6, %v40_v6  ;;  %v44_v13 = vmul.f32 %v42_v2, %v40_v6 }
  0x28   :  { %v62_v8 = vsel %vm45_vm0, %v60_v3, 0.0  ;;  %v54_v9 = vsel %vm45_vm0, %v52_v4, 0.0  ;;  %v46_v14 = vsel %vm45_vm0, %v43_v12, 0.0 }
  0x29   :  { %63 = vadd.xlane.f32.xlu1 %v62_v8  ;;  %55 = vadd.xlane.f32.xlu0 %v54_v9  ;;  %v65_v10 = vsel %vm45_vm0, %v61_v5, 0.0  ;;  %v57_v11 = vsel %vm45_vm0, %v53_v7, 0.0  ;;  %v49_v15 = vsel %vm45_vm0, %v44_v13, 0.0 }
  0x2d   :  { %66 = vadd.xlane.f32.xlu1 %v65_v10  ;;  %58 = vadd.xlane.f32.xlu0 %v57_v11 }
  0x31   :  { %47 = vadd.xlane.f32.xlu0 %v46_v14  ;;  %50 = vadd.xlane.f32.xlu1 %v49_v15 }
  0xb6   :  { %v64_v16 = vpop.xlane.xlu1 %63  ;;  %v56_v17 = vpop.xlane.xlu0 %55 }
  0xb7   :  { %v68_v18 = vmul.f32 %v64_v16, %v56_v17 }
  0xb9   :  { %v70_v19 = vmax.f32 %v68_v18, 1e-16 }
  0xba   :  { %v67_v20 = vpop.xlane.xlu1 %66  ;;  %v59_v21 = vpop.xlane.xlu0 %58 }
  0xbb   :  { %91 = vrsqrt.f32 %v70_v19  ;;  %v69_v22 = vmul.f32 %v67_v20, %v59_v21 }
  0xbd   :  { %v71_v23 = vmax.f32 %v69_v22, 1e-16 }
  0xbe   :  { %v48_v24 = vpop.xlane.xlu0 %47  ;;  %v51_v27 = vpop.xlane.xlu1 %50 }
  0xbf   :  { %93 = vrsqrt.f32 %v71_v23 }
  0xc5   :  { %v92_v25 = vpop.eup %91 }
  0xc6   :  { %v74_v26 = vmul.f32 %v92_v25, %v48_v24 }
  0xc8   :  { %v76_v28 = vmul.f32 20.0, %v74_v26 }
  0xc9   :  { %v94_v29 = vpop.eup %93 }
  0xca   :  { %79 = vst.msk [vmem:[%s200_s2] sm:$0xff] %vm78_vm1, %v76_v28  ;;  %v75_v30 = vmul.f32 %v94_v29, %v51_v27 }
  0xcc   :  { %v77_v31 = vmul.f32 20.0, %v75_v30 }
  0xce   :  { %80 = vst.msk [vmem:[%s200_s2 + $0x8] sm:$0xff] %vm78_vm1, %v77_v31 }
  0xcf   :  { %85 = vsyncpa [#allocation3], 1 }
  0xd0   :  { %86 = vsyncpa [#allocation5], 1 }

</bundles_post_ra>
